<compile_context>
chip_gen: v7x
topology: tpu7x:2x2x1
jax: 0.10.0
libtpu: 0.0.40
codegen_flags: <defaults>
</compile_context>

<pallas_src>
import jax
import jax.numpy as jnp
from jax.experimental import pallas as pl
from jax.experimental.pallas import tpu as pltpu

LANE = 128
ROW_PACK = 16          # bf16 sublane packing: 16 rows per packed vreg group
NEG_INF = -1e30        # pad-column bias for fc3 -> exp() underflows to exactly 0


def _round_up(n, m):
    return (n + m - 1) // m * m


def mlp_softmax_kernel(x_ref, w1_ref, b1_ref, w2_ref, b2_ref, w3_ref, b3_ref,
                       out_ref):
    # x_ref: (TB, in_dim) f32; w*: bf16 (lane-dense 128); b*: f32.
    x = x_ref[...].astype(jnp.bfloat16)

    # fc1 + relu (f32 accumulation on the MXU)
    h = jnp.dot(x, w1_ref[...], preferred_element_type=jnp.float32) + b1_ref[...]
    h = jnp.maximum(h, 0.0)

    # fc2 + relu
    h = jnp.dot(h.astype(jnp.bfloat16), w2_ref[...],
                preferred_element_type=jnp.float32) + b2_ref[...]
    h = jnp.maximum(h, 0.0)

    # fc3 (padded output columns get a -1e30 bias)
    logits = jnp.dot(h.astype(jnp.bfloat16), w3_ref[...],
                     preferred_element_type=jnp.float32) + b3_ref[...]

    # Numerically-stable softmax over the lane-dense 128-wide logits
    # (== PyTorch softmax(dim=1); pad columns contribute exactly 0).
    m = jnp.max(logits, axis=-1, keepdims=True)
    e = jnp.exp(logits - m)
    s = jnp.sum(e, axis=-1, keepdims=True)
    probs = e / s                              # exact divide -> rows sum to 1

    # Narrow store: only the real output columns go back to HBM.
    out_ref[...] = probs[:, :out_ref.shape[1]].astype(out_ref.dtype)


def net_forward(x, params, *, block_b=1024):
    """x: [B, in_dim] float32.  Returns [B, out_dim] float32 softmax probs."""
    B, in_dim = x.shape
    assert in_dim == params["in_dim"]
    out_dim = params["out_dim"]
    in_w, hid_p = params["w1"].shape
    assert in_w == in_dim
    out_p = params["w3"].shape[1]

    # Batch padding/tiling: 16-row aligned (bf16 sublane pack).  Aim for >= 2
    # grid steps when the batch allows it so "parallel" actually shards across
    # both v7x TensorCores, while capping the tile at block_b.
    b_pad = _round_up(max(B, 1), ROW_PACK)
    tb = min(block_b, _round_up(pl.cdiv(b_pad, 2), ROW_PACK))
    tb = max(tb, ROW_PACK)
    b_pad = _round_up(b_pad, tb)
    grid = (b_pad // tb,)

    # Only pad the batch dim (no lane padding, no host-side cast).
    if b_pad != B:
        x_p = jnp.zeros((b_pad, in_dim), jnp.float32).at[:B, :].set(x)
    else:
        x_p = x

    flops = 2 * b_pad * (in_dim * hid_p + hid_p * hid_p + hid_p * out_p)
    bytes_accessed = (
        x_p.size * 4
        + (params["w1"].size + params["w2"].size + params["w3"].size) * 2
        + (params["b1"].size + params["b2"].size + params["b3"].size) * 4
        + b_pad * out_dim * 4
    )
    cost = pl.CostEstimate(flops=flops, transcendentals=b_pad * out_p,
                           bytes_accessed=bytes_accessed)

    def resident(shape):
        # Full-array block, constant index_map -> stays in VMEM across steps.
        return pl.BlockSpec(shape, lambda i: (0, 0))

    out = pl.pallas_call(
        mlp_softmax_kernel,
        out_shape=jax.ShapeDtypeStruct((b_pad, out_dim), jnp.float32),
        grid=grid,
        in_specs=[
            pl.BlockSpec((tb, in_dim), lambda i: (i, 0)),  # x: batch-tiled
            resident((in_dim, hid_p)),                     # w1 (unpadded rows)
            resident((1, hid_p)),                          # b1
            resident((hid_p, hid_p)),                      # w2
            resident((1, hid_p)),                          # b2
            resident((hid_p, out_p)),                      # w3
            resident((1, out_p)),                          # b3
        ],
        out_specs=pl.BlockSpec((tb, out_dim), lambda i: (i, 0)),
        compiler_params=pltpu.CompilerParams(
            dimension_semantics=("parallel",),
            vmem_limit_bytes=32 * 1024 * 1024,
        ),
        cost_estimate=cost,
    )(x_p, params["w1"], params["b1"], params["w2"], params["b2"],
      params["w3"], params["b3"])

    return out[:B, :]


def init_params(key, in_dim, hidden, out_dim):
    """nn.Linear-style U(-1/sqrt(fan_in), 1/sqrt(fan_in)) init.

    Weights are stored pre-transposed [in, out]; hidden/output dims are
    zero-padded to 128 lanes and cast to bf16.  w1's input dim is left
    unpadded (full-array BlockSpec dim).  Biases stay f32; fc3's padded bias
    columns are -1e30 so the in-kernel softmax ignores the pad region."""
    ks = jax.random.split(key, 6)
    hid_p = _round_up(hidden, LANE)
    out_p = _round_up(out_dim, LANE)

    def lin(kw, kb, fan_in, fan_out, fi_p, fo_p, pad_bias):
        bound = 1.0 / (float(fan_in) ** 0.5)
        w = jax.random.uniform(kw, (fan_in, fan_out), jnp.float32, -bound, bound)
        b = jax.random.uniform(kb, (fan_out,), jnp.float32, -bound, bound)
        w_p = jnp.zeros((fi_p, fo_p), jnp.float32).at[:fan_in, :fan_out].set(w)
        b_p = jnp.full((1, fo_p), pad_bias, jnp.float32).at[0, :fan_out].set(b)
        return w_p.astype(jnp.bfloat16), b_p

    w1, b1 = lin(ks[0], ks[1], in_dim, hidden, in_dim, hid_p, 0.0)
    w2, b2 = lin(ks[2], ks[3], hidden, hidden, hid_p, hid_p, 0.0)
    w3, b3 = lin(ks[4], ks[5], hidden, out_dim, hid_p, out_p, NEG_INF)
    return {"w1": w1, "b1": b1, "w2": w2, "b2": b2, "w3": w3, "b3": b3,
            "in_dim": in_dim, "out_dim": out_dim}


def ref_forward(x, params):
    """Pure-JAX reference using the same (padded, bf16) parameters."""
    xb = x.astype(jnp.bfloat16)
    h = jnp.maximum(jnp.dot(xb, params["w1"],
                            preferred_element_type=jnp.float32) + params["b1"], 0.0)
    h = jnp.maximum(jnp.dot(h.astype(jnp.bfloat16), params["w2"],
                            preferred_element_type=jnp.float32) + params["b2"], 0.0)
    logits = jnp.dot(h.astype(jnp.bfloat16), params["w3"],
                     preferred_element_type=jnp.float32) + params["b3"]
    return jax.nn.softmax(logits, axis=-1)[:, :params["out_dim"]]


if __name__ == "__main__":
    # Shapes implied by the module: fc1 = Linear(len(training[0]), 8),
    # fc2 = Linear(8, 8), fc3 = Linear(8, len(output[0])).
    # B=30 exercises batch padding (-> 32) and a 2-step grid (tb=16).
    B, IN, HID, OUT = 30, 16, 8, 4

    key = jax.random.PRNGKey(0)
    k_x, k_p = jax.random.split(key)
    x = jax.random.normal(k_x, (B, IN), dtype=jnp.float32)
    params = init_params(k_p, IN, HID, OUT)

    y = net_forward(x, params)
    y = jax.block_until_ready(y)

    # Sanity: shape, softmax rows sum to 1, matches pure-JAX reference.
    assert y.shape == (B, OUT)
    row_sums = jnp.sum(y, axis=1)
    assert jnp.allclose(row_sums, 1.0, atol=1e-4), \
        float(jnp.max(jnp.abs(row_sums - 1.0)))
    y_ref = ref_forward(x, params)
    assert jnp.allclose(y, y_ref, atol=2e-3), \
        float(jnp.max(jnp.abs(y - y_ref)))

    print("KERNEL_OK")
</pallas_src>

<mosaic_0001>
module attributes {stable_mosaic.version = 11 : i64} {
  func.func @mlp_softmax_kernel(%arg0: i32, %arg1: memref<16x16xf32, #tpu.memory_space<vmem>>, %arg2: memref<16x128xbf16, #tpu.memory_space<vmem>>, %arg3: memref<1x128xf32, #tpu.memory_space<vmem>>, %arg4: memref<128x128xbf16, #tpu.memory_space<vmem>>, %arg5: memref<1x128xf32, #tpu.memory_space<vmem>>, %arg6: memref<128x128xbf16, #tpu.memory_space<vmem>>, %arg7: memref<1x128xf32, #tpu.memory_space<vmem>>, %arg8: memref<16x4xf32, #tpu.memory_space<vmem>>) attributes {dimension_semantics = [#tpu.dimension_semantics<parallel>], iteration_bounds = array<i64: 2>, scalar_prefetch = 0 : i64, scratch_operands = 0 : i64, tpu.core_type = #tpu.core_type<tc>, window_params = [{transform_indices = @transform_0, window_bounds = array<i64: 16, 16>}, {pipeline_mode = #tpu.pipeline_mode<synchronous>, transform_indices = @transform_1, window_bounds = array<i64: 16, 128>}, {pipeline_mode = #tpu.pipeline_mode<synchronous>, transform_indices = @transform_2, window_bounds = array<i64: 1, 128>}, {pipeline_mode = #tpu.pipeline_mode<synchronous>, transform_indices = @transform_3, window_bounds = array<i64: 128, 128>}, {pipeline_mode = #tpu.pipeline_mode<synchronous>, transform_indices = @transform_4, window_bounds = array<i64: 1, 128>}, {pipeline_mode = #tpu.pipeline_mode<synchronous>, transform_indices = @transform_5, window_bounds = array<i64: 128, 128>}, {pipeline_mode = #tpu.pipeline_mode<synchronous>, transform_indices = @transform_6, window_bounds = array<i64: 1, 128>}, {transform_indices = @transform_7, window_bounds = array<i64: 16, 4>}]} {
    %c0 = arith.constant 0 : index
    %c0_0 = arith.constant 0 : index
    %0 = vector.load %arg1[%c0, %c0_0] : memref<16x16xf32, #tpu.memory_space<vmem>>, vector<16x16xf32>
    %1 = arith.truncf %0 : vector<16x16xf32> to vector<16x16xbf16>
    %c0_1 = arith.constant 0 : index
    %c0_2 = arith.constant 0 : index
    %2 = vector.load %arg2[%c0_1, %c0_2] : memref<16x128xbf16, #tpu.memory_space<vmem>>, vector<16x128xbf16>
    %cst = arith.constant dense<0.000000e+00> : vector<16x128xf32>
    %3 = tpu.matmul %1, %2, %cst {dimension_numbers = #tpu.dot_dimension_numbers<[1], [0], [0], [1], [0, 0, 1, 1], [], []>} : vector<16x16xbf16>, vector<16x128xbf16>, vector<16x128xf32> -> vector<16x128xf32>
    %c0_3 = arith.constant 0 : index
    %c0_4 = arith.constant 0 : index
    %4 = vector.load %arg3[%c0_3, %c0_4] : memref<1x128xf32, #tpu.memory_space<vmem>>, vector<1x128xf32>
    %5 = vector.broadcast %4 : vector<1x128xf32> to vector<16x128xf32>
    %6 = arith.addf %3, %5 : vector<16x128xf32>
    %cst_5 = arith.constant 0.000000e+00 : f32
    %7 = vector.broadcast %cst_5 : f32 to vector<16x128xf32>
    %8 = arith.maximumf %6, %7 : vector<16x128xf32>
    %9 = arith.truncf %8 : vector<16x128xf32> to vector<16x128xbf16>
    %c0_6 = arith.constant 0 : index
    %c0_7 = arith.constant 0 : index
    %10 = vector.load %arg4[%c0_6, %c0_7] : memref<128x128xbf16, #tpu.memory_space<vmem>>, vector<128x128xbf16>
    %cst_8 = arith.constant dense<0.000000e+00> : vector<16x128xf32>
    %11 = tpu.matmul %9, %10, %cst_8 {dimension_numbers = #tpu.dot_dimension_numbers<[1], [0], [0], [1], [0, 0, 1, 1], [], []>} : vector<16x128xbf16>, vector<128x128xbf16>, vector<16x128xf32> -> vector<16x128xf32>
    %c0_9 = arith.constant 0 : index
    %c0_10 = arith.constant 0 : index
    %12 = vector.load %arg5[%c0_9, %c0_10] : memref<1x128xf32, #tpu.memory_space<vmem>>, vector<1x128xf32>
    %13 = vector.broadcast %12 : vector<1x128xf32> to vector<16x128xf32>
    %14 = arith.addf %11, %13 : vector<16x128xf32>
    %cst_11 = arith.constant 0.000000e+00 : f32
    %15 = vector.broadcast %cst_11 : f32 to vector<16x128xf32>
    %16 = arith.maximumf %14, %15 : vector<16x128xf32>
    %17 = arith.truncf %16 : vector<16x128xf32> to vector<16x128xbf16>
    %c0_12 = arith.constant 0 : index
    %c0_13 = arith.constant 0 : index
    %18 = vector.load %arg6[%c0_12, %c0_13] : memref<128x128xbf16, #tpu.memory_space<vmem>>, vector<128x128xbf16>
    %cst_14 = arith.constant dense<0.000000e+00> : vector<16x128xf32>
    %19 = tpu.matmul %17, %18, %cst_14 {dimension_numbers = #tpu.dot_dimension_numbers<[1], [0], [0], [1], [0, 0, 1, 1], [], []>} : vector<16x128xbf16>, vector<128x128xbf16>, vector<16x128xf32> -> vector<16x128xf32>
    %c0_15 = arith.constant 0 : index
    %c0_16 = arith.constant 0 : index
    %20 = vector.load %arg7[%c0_15, %c0_16] : memref<1x128xf32, #tpu.memory_space<vmem>>, vector<1x128xf32>
    %21 = vector.broadcast %20 : vector<1x128xf32> to vector<16x128xf32>
    %22 = arith.addf %19, %21 : vector<16x128xf32>
    %cst_17 = arith.constant dense<0xFF800000> : vector<16xf32>
    %23 = vector.multi_reduction <maximumf>, %22, %cst_17 [1] : vector<16x128xf32> to vector<16xf32>
    %24 = vector.shape_cast %23 : vector<16xf32> to vector<16x1xf32>
    %25 = vector.broadcast %24 : vector<16x1xf32> to vector<16x128xf32>
    %26 = arith.subf %22, %25 : vector<16x128xf32>
    %27 = math.exp %26 : vector<16x128xf32>
    %cst_18 = arith.constant dense<0.000000e+00> : vector<16xf32>
    %28 = vector.multi_reduction <add>, %27, %cst_18 [1] : vector<16x128xf32> to vector<16xf32>
    %29 = vector.shape_cast %28 : vector<16xf32> to vector<16x1xf32>
    %30 = vector.broadcast %29 : vector<16x1xf32> to vector<16x128xf32>
    %31 = arith.divf %27, %30 : vector<16x128xf32>
    %32 = vector.extract_strided_slice %31 {offsets = [0, 0], sizes = [16, 4], strides = [1, 1]} : vector<16x128xf32> to vector<16x4xf32>
    %c0_19 = arith.constant 0 : index
    %c0_20 = arith.constant 0 : index
    %33 = vector.load %arg8[%c0_19, %c0_20] : memref<16x4xf32, #tpu.memory_space<vmem>>, vector<16x4xf32>
    tpu.vector_store %arg8[%c0_19, %c0_20], %32 {strides = array<i32>} : memref<16x4xf32, #tpu.memory_space<vmem>>, vector<16x4xf32>,
    return
  }
  func.func @transform_0(%arg0: i32) -> (i32, i32) {
    %c0_i32 = arith.constant 0 : i32
    %c0_i32_0 = arith.constant 0 : i32
    return %arg0, %c0_i32 : i32, i32
  }
  func.func @transform_1(%arg0: i32) -> (i32, i32) {
    %c0_i32 = arith.constant 0 : i32
    %c0_i32_0 = arith.constant 0 : i32
    %c0_i32_1 = arith.constant 0 : i32
    return %c0_i32, %c0_i32_0 : i32, i32
  }
  func.func @transform_2(%arg0: i32) -> (i32, i32) {
    %c0_i32 = arith.constant 0 : i32
    %c0_i32_0 = arith.constant 0 : i32
    %c0_i32_1 = arith.constant 0 : i32
    return %c0_i32, %c0_i32_0 : i32, i32
  }
  func.func @transform_3(%arg0: i32) -> (i32, i32) {
    %c0_i32 = arith.constant 0 : i32
    %c0_i32_0 = arith.constant 0 : i32
    %c0_i32_1 = arith.constant 0 : i32
    return %c0_i32, %c0_i32_0 : i32, i32
  }
  func.func @transform_4(%arg0: i32) -> (i32, i32) {
    %c0_i32 = arith.constant 0 : i32
    %c0_i32_0 = arith.constant 0 : i32
    %c0_i32_1 = arith.constant 0 : i32
    return %c0_i32, %c0_i32_0 : i32, i32
  }
  func.func @transform_5(%arg0: i32) -> (i32, i32) {
    %c0_i32 = arith.constant 0 : i32
    %c0_i32_0 = arith.constant 0 : i32
    %c0_i32_1 = arith.constant 0 : i32
    return %c0_i32, %c0_i32_0 : i32, i32
  }
  func.func @transform_6(%arg0: i32) -> (i32, i32) {
    %c0_i32 = arith.constant 0 : i32
    %c0_i32_0 = arith.constant 0 : i32
    %c0_i32_1 = arith.constant 0 : i32
    return %c0_i32, %c0_i32_0 : i32, i32
  }
  func.func @transform_7(%arg0: i32) -> (i32, i32) {
    %c0_i32 = arith.constant 0 : i32
    %c0_i32_0 = arith.constant 0 : i32
    return %arg0, %c0_i32 : i32, i32
  }
}

</mosaic_0001>

<bundles_post_ra>
// kernel: tpu_custom_call.1
= control target key start
LH: loop header
LB: loop body
LE: loop exit
PB: predicated region body
PF: predicated region fallthrough
CT: control target
= control target key end

     0   :  { %12 = vsyncpa [#allocation3], 0  ;;  %s1142_s0 = inlined_call_operand.vmem [shape: f32[32,16], index: 0, kind: input, shape index: {}]   ;;  %s1143_s1 = inlined_call_operand.hbm [shape: bf16[16,128], index: 1, kind: input, shape index: {}]   ;;  %s1144_s2 = inlined_call_operand.vmem [shape: f32[1,128], index: 2, kind: input, shape index: {}]   ;;  %s1145_s3 = inlined_call_operand.hbm [shape: bf16[128,128], index: 3, kind: input, shape index: {}]   ;;  %s1146_s4 = inlined_call_operand.vmem [shape: f32[1,128], index: 4, kind: input, shape index: {}]   ;;  %s1147_s5 = inlined_call_operand.vmem [shape: bf16[128,128], index: 5, kind: input, shape index: {}]   ;;  %s1148_s6 = inlined_call_operand.vmem [shape: f32[1,128], index: 6, kind: input, shape index: {}]   ;;  %s1149_s7 = inlined_call_operand.vmem [shape: f32[32,4], index: 7, kind: output, shape index: {}]  }
   0x1   :  { %13 = vsyncpa [#allocation5], 0  ;;  %s983_s24 = smov 0  }
   0x2 LB: > { %s705_s25 = sadd.s32 4294967295, %s935_s24   ;;  %p707_p0 = scmp.ge.s32.totalorder %s935_s24, 1  ;;  %s935_s24 = sphi %s983_s24, %s19_s24  }
   0x3   : > { %p202_p1 = scmp.lt.s32.totalorder %s935_s24, 3  ;;  %s937_s26 = smov [#allocation2]  }
   0x4   : > { %s214_s27 = sshll.u32 %s937_s26, 4  ;;  %p997_p3 = scmp.eq.s32.totalorder %s705_s25, 0  ;;  %s215_s27 = int_to_ptr.vmem [resolvable:$true] %s214_s27 }
   0x5   : > { %p991_p2 = pnand %p707_p0, %p202_p1  ;;  %s938_s30 = smov [#allocation4]  }
   0x6   : > { %s1154_s29 = scalar_select %p997_p3, 1, 0 }
   0x7   : > { %s1153_s28 = scalar_select %p991_p2, 1, 0 }
   0x8   : > { %p815_p4 = pneg %p991_p2  ;;  %s230_s8 = sshll.u32 %s938_s30, 4  ;;  %s1009_s8 = int_to_ptr.vmem [resolvable:$true] %s230_s8 }
   0x9   : > { %s865_s12 = scalar_lea.hbm %s1143_s1, 128 }
   0xa   : > { %p1005_p5 = pnand %p997_p3, %p815_p4  ;;  %p866_p6 = scmp.ne.s32.totalorder %s1143_s1, %s865_s12 }
   0xb   : > { %p872_p10 = scmp.lt.u32.totalorder %s865_s12, %s1143_s1 }
   0xc   : > { %p867_p7 = pneg %p1005_p5 }
   0xe   : > { %p868_p8 = pnand %p867_p7, %p866_p6 }
  0x10   : > { %p869_p9 = pneg %p868_p8 }
  0x12   : > { %p874_p11 = pnand %p872_p10, %p869_p9 }
  0x14   : > { %877 = shalt.err (!%p874_p11)
}
  0x15   : > { %s878_s17 = scalar_lea.vmem %s215_s27, 128  ;;  %p886_p1 = scmp.lt.s32.totalorder %s215_s27, %s215_s27 }
  0x16   : > { %p879_p12 = scmp.ne.s32.totalorder %s215_s27, %s878_s17  ;;  %p887_p4 = scmp.lt.s32.totalorder %s878_s17, %s878_s17 }
  0x18   : > { %p881_p13 = pnand %p879_p12, %p867_p7  ;;  %p888_p3 = por %p887_p4, %p886_p1 }
  0x1a   : > { %p882_p0 = pneg %p881_p13 }
  0x1c   : > { %p889_p2 = pnand %p888_p3, %p882_p0 }
  0x1e   : > { %892 = shalt.err (!%p889_p2)
}
  0x1f   : > { %s939_s18 = smov 64   ;;  %s940_s19 = smov 4  }
  0x20   : > { %818 = dma.hbm_to_vmem [thread:$0]  (!%p1005_p5), %s1143_s1, 128, %s215_s27, [#allocation3], %s939_s18, %s939_s18, %s940_s19  }
  0x21   : > { %s893_s26 = scalar_lea.hbm %s1145_s3, 1024 }
  0x22   : > { %p894_p6 = scmp.ne.s32.totalorder %s1145_s3, %s893_s26  ;;  %p900_p8 = scmp.lt.u32.totalorder %s893_s26, %s1145_s3 }
  0x24   : > { %p896_p2 = pnand %p894_p6, %p867_p7 }
  0x26   : > { %p897_p3 = pneg %p896_p2 }
  0x28   : > { %p902_p9 = pnand %p900_p8, %p897_p3 }
  0x2a   : > { %905 = shalt.err (!%p902_p9)
}
  0x2b   : > { %s906_s27 = scalar_lea.vmem %s1009_s8, 1024  ;;  %p914_p13 = scmp.lt.s32.totalorder %s1009_s8, %s1009_s8 }
  0x2c   : > { %p907_p10 = scmp.ne.s32.totalorder %s1009_s8, %s906_s27  ;;  %p915_p0 = scmp.lt.s32.totalorder %s906_s27, %s906_s27 }
  0x2e   : > { %p909_p11 = pnand %p907_p10, %p867_p7  ;;  %p916_p1 = por %p915_p0, %p914_p13 }
  0x30   : > { %p910_p12 = pneg %p909_p11 }
  0x32   : > { %p917_p4 = pnand %p916_p1, %p910_p12 }
  0x34   : > { %920 = shalt.err (!%p917_p4)
}
  0x35   : > { %821 = dma.hbm_to_vmem [thread:$0]  (!%p1005_p5), %s1145_s3, 1024, %s1009_s8, [#allocation5], %s939_s18, %s939_s18, %s940_s19  }
  0x36   : > { %p1156_p6 = scmp.ne.s32.totalorder %s1153_s28, 0 }
  0x37   : > { %p1157_p2 = scmp.ne.s32.totalorder (!%p1156_p6), %s1154_s29, 0 }
  0x38   : > { %264 = sbr.rel (%p1156_p6) target bundleno = 1046 (0x416), region = 48 }
  0x3f   : > { %926 = dma.done.wait (%p1157_p2), [#allocation3], 128  }
  0x40   : > { %928 = vsyncadd (%p1157_p2), [#allocation3], 4294967168 }
  0x41   : > { %930 = dma.done.wait (%p1157_p2), [#allocation5], 1024  }
  0x42   : > { %932 = vsyncadd (%p1157_p2), [#allocation5], 4294966272  ;;  %s714_s9 = sshll.u32 %s705_s25, 1  ;;  %v941_v0 = vmov 0.0   ;;  %vm942_vm0 = vmmov 0   ;;  %v840_v1 = vld [vmem:[#allocation2] sm:$0xff]  }
  0x43   : > { %761 = vmatprep.subr.bf16.mxu0 %v941_v0  ;;  %763 = vmatprep.mubr.msk.bf16.mxu0 %vm942_vm0, %v941_v0  ;;  %p301_p5 = scmp.lt.s32.totalorder %s714_s9, 3  ;;  %vm331_vm1 = vcmask 130048   ;;  %v841_v5 = vld [vmem:[#allocation4] sm:$0xff]   ;;  %v842_v6 = vld [vmem:[#allocation4 + $0x8] sm:$0xff]   ;;  %v843_v7 = vld [vmem:[#allocation4 + $0x10] sm:$0xff]   ;;  %vm624_vm2 = vcmask 31744  }
  0x44   : > { %767 = vmatprep.subr.bf16.mxu1 %v941_v0  ;;  %783 = vmatprep.mubr.msk.bf16.mxu1 %vm942_vm0, %v941_v0  ;;  %v844_v8 = vld [vmem:[#allocation4 + $0x18] sm:$0xff]   ;;  %v845_v9 = vld [vmem:[#allocation4 + $0x20] sm:$0xff]   ;;  %v846_v10 = vld [vmem:[#allocation4 + $0x28] sm:$0xff]  }
  0x45   : > { %s1159_s9 = smov (!%p301_p5, %s714_s9), 3  ;;  %762 = vmatpush3.bf16.msra.mxu0 %v840_v1  ;;  %768 = vmatpush3.bf16.msra.mxu1 %v841_v5  ;;  %v847_v11 = vld [vmem:[#allocation4 + $0x30] sm:$0xff]   ;;  %v848_v12 = vld [vmem:[#allocation4 + $0x38] sm:$0xff]   ;;  %v850_v14 = vld [vmem:[%s1147_s5 + $0x8] sm:$0xff]  }
  0x46   : > { %s715_s28 = sshll.u32 %s1159_s9, 3  ;;  %787 = vmatprep.subr.bf16.mxu0 %v941_v0  ;;  %769 = vmatprep.subr.bf16.mxu1 %v941_v0  ;;  %v849_v13 = vld [vmem:[%s1147_s5] sm:$0xff]   ;;  %v851_v15 = vld [vmem:[%s1147_s5 + $0x10] sm:$0xff]   ;;  %v852_v16 = vld [vmem:[%s1147_s5 + $0x18] sm:$0xff]  }
  0x47   : > { %s304_s8 = scalar_lea.vmem %s1142_s0, %s715_s28  ;;  %v853_v17 = vld [vmem:[%s1147_s5 + $0x20] sm:$0xff]   ;;  %v854_v18 = vld [vmem:[%s1147_s5 + $0x28] sm:$0xff]   ;;  %v855_v29 = vld [vmem:[%s1147_s5 + $0x30] sm:$0xff]   ;;  %s310_s19 = scalar_lea.vmem %s1149_s7, %s715_s28 }
  0x48   : > { %v313_v2 = vld [vmem:[%s304_s8] sm:$0xff]  ;;  %v314_v3 = vld [vmem:[%s304_s8 + $0x8] sm:$0xff]  ;;  %v856_v30 = vld [vmem:[%s1147_s5 + $0x38] sm:$0xff]  }
  0x49   : > { %v315_v4 = vpack.c.bf16 %v314_v3, %v313_v2  ;;  %770 = vmatpush3.bf16.msra.mxu1 %v842_v6  ;;  %v718_v19 = vld [vmem:[%s1144_s2] ss:$0 sm:$0xff] }
  0x4a   : > { %771 = vmatprep.subr.bf16.mxu1 %v941_v0  ;;  %v721_v31 = vld [vmem:[%s1146_s4] ss:$0 sm:$0xff] }
  0x4b   : > { %764 = vmatmul.mubr.msk.bf16.vlgmr.msra.gmra.mrb[0].mxu0 %vm331_vm1, %v315_v4  ;;  %v730_v41 = vld [vmem:[%s1148_s6] ss:$0 sm:$0xff] }
  0x4c   : > { %803 = vmatprep.mubr.msk.bf16.mxu0 %vm942_vm0, %v941_v0  ;;  %788 = vmatpush3.bf16.msra.mxu0 %v849_v13 }
  0x4d   : > { %772 = vmatpush3.bf16.msra.mxu1 %v843_v7  ;;  %789 = vmatprep.subr.bf16.mxu0 %v941_v0 }
  0x4e   : > { %773 = vmatprep.subr.bf16.mxu1 %v941_v0 }
  0x50   : > { %790 = vmatpush3.bf16.msra.mxu0 %v850_v14 }
  0x51   : > { %774 = vmatpush3.bf16.msra.mxu1 %v844_v8  ;;  %791 = vmatprep.subr.bf16.mxu0 %v941_v0 }
  0x52   : > { %775 = vmatprep.subr.bf16.mxu1 %v941_v0 }
  0x54   : > { %792 = vmatpush3.bf16.msra.mxu0 %v851_v15 }
  0x55   : > { %776 = vmatpush3.bf16.msra.mxu1 %v845_v9  ;;  %793 = vmatprep.subr.bf16.mxu0 %v941_v0 }
  0x56   : > { %777 = vmatprep.subr.bf16.mxu1 %v941_v0 }
  0x58   : > { %794 = vmatpush3.bf16.msra.mxu0 %v852_v16 }
  0x59   : > { %778 = vmatpush3.bf16.msra.mxu1 %v846_v10  ;;  %795 = vmatprep.subr.bf16.mxu0 %v941_v0 }
  0x5a   : > { %779 = vmatprep.subr.bf16.mxu1 %v941_v0 }
  0x5c   : > { %796 = vmatpush3.bf16.msra.mxu0 %v853_v17 }
  0x5d   : > { %780 = vmatpush3.bf16.msra.mxu1 %v847_v11  ;;  %797 = vmatprep.subr.bf16.mxu0 %v941_v0 }
  0x5e   : > { %781 = vmatprep.subr.bf16.mxu1 %v941_v0 }
  0x60   : > { %798 = vmatpush3.bf16.msra.mxu0 %v854_v18 }
  0x61   : > { %782 = vmatpush3.bf16.msra.mxu1 %v848_v12  ;;  %799 = vmatprep.subr.bf16.mxu0 %v941_v0 }
  0x64   : > { %800 = vmatpush3.bf16.msra.mxu0 %v855_v29 }
  0x65   : > { %801 = vmatprep.subr.bf16.mxu0 %v941_v0 }
  0x68   : > { %802 = vmatpush3.bf16.msra.mxu0 %v856_v30 }
 0x11e   : > { %v369_v20 = vpop.f32.mrb[0].mxu0 }
 0x11f   : > { %v370_v21 = vadd.f32 %v718_v19, %v369_v20  ;;  %v765_v22 = vpop.f32.mrb[1].mxu0 }
 0x120   : > { %v372_v23 = vpop.f32.mrb[2].mxu0 }
 0x121   : > { %v373_v24 = vadd.f32 %v718_v19, %v372_v23  ;;  %v766_v25 = vpop.f32.mrb[3].mxu0  ;;  %v376_v26 = vmax.f32 %v370_v21, 0.0 }
 0x123   : > { %v377_v27 = vmax.f32 %v373_v24, 0.0 }
 0x125   : > { %v378_v28 = vpack.c.bf16 %v377_v27, %v376_v26 }
 0x127   : > { %784 = vmatmul.mubr.bf16.vlgmr.msra.gmra.mrb[0].mxu1 %v378_v28 }
 0x1fa   : > { %v484_v32 = vpop.f32.mrb[0].mxu1 }
 0x1fb   : > { %v485_v33 = vadd.f32 %v721_v31, %v484_v32  ;;  %v785_v34 = vpop.f32.mrb[1].mxu1 }
 0x1fc   : > { %v487_v35 = vpop.f32.mrb[2].mxu1 }
 0x1fd   : > { %v488_v36 = vadd.f32 %v721_v31, %v487_v35  ;;  %v786_v37 = vpop.f32.mrb[3].mxu1  ;;  %v491_v38 = vmax.f32 %v485_v33, 0.0 }
 0x1ff   : > { %v492_v39 = vmax.f32 %v488_v36, 0.0 }
 0x201   : > { %v493_v40 = vpack.c.bf16 %v492_v39, %v491_v38 }
 0x203   : > { %804 = vmatmul.mubr.bf16.vlgmr.msra.gmra.mrb[4].mxu0 %v493_v40 }
 0x2d6   : > { %v599_v42 = vpop.f32.mrb[4].mxu0 }
 0x2d7   : > { %v600_v43 = vadd.f32 %v730_v41, %v599_v42  ;;  %v805_v44 = vpop.f32.mrb[5].mxu0 }
 0x2d8   : > { %v602_v45 = vpop.f32.mrb[6].mxu0 }
 0x2d9   : > { %606 = vmax.xlane.f32.xlu0 %v600_v43  ;;  %v806_v46 = vpop.f32.mrb[7].mxu0  ;;  %v603_v47 = vadd.f32 %v730_v41, %v602_v45 }
 0x2dd   : > { %608 = vmax.xlane.f32.xlu0 %v603_v47 }
 0x366   : > { %v607_v48 = vpop.xlane.xlu0 %606 }
 0x367   : > { %v610_v49 = vsub.f32 %v600_v43, %v607_v48 }
 0x369   : > { %v612_v50 = vmul.f32 1.442695, %v610_v49 }
 0x36a   : > { %v609_v51 = vpop.xlane.xlu0 %608 }
 0x36b   : > { %857 = vpow2.f32 %v612_v50  ;;  %v611_v52 = vsub.f32 %v603_v47, %v609_v51 }
 0x36d   : > { %v614_v53 = vmul.f32 1.442695, %v611_v52 }
 0x36f   : > { %859 = vpow2.f32 %v614_v53 }
 0x375   : > { %v858_v54 = vpop.eup %857 }
 0x376   : > { %616 = vadd.xlane.f32.xlu1 %v858_v54 }
 0x379   : > { %v860_v55 = vpop.eup %859 }
 0x37a   : > { %618 = vadd.xlane.f32.xlu1 %v860_v55 }
 0x403   : > { %v617_v56 = vpop.xlane.xlu1 %616 }
 0x404   : > { %861 = vrcp.f32 %v617_v56 }
 0x407   : > { %v619_v57 = vpop.xlane.xlu1 %618 }
 0x408   : > { %863 = vrcp.f32 %v619_v57 }
 0x40e   : > { %v862_v58 = vpop.eup %861 }
 0x40f   : > { %v621_v59 = vmul.f32 %v862_v58, %v858_v54 }
 0x411   : > { %625 = vst.msk [vmem:[%s310_s19] sm:$0xff] %vm624_vm2, %v621_v59 }
 0x412   : > { %v864_v60 = vpop.eup %863 }
 0x413   : > { %v623_v61 = vmul.f32 %v864_v60, %v860_v55 }
 0x415   : > { %626 = vst.msk [vmem:[%s310_s19 + $0x8] sm:$0xff] %vm624_vm2, %v623_v61 }
 0x416 PF: > { %s19_s24 = sadd.s32 1, %s935_s24  }
 0x417   : > { %p16_p7 = scmp.ge.s32.totalorder %s19_s24, 4  }
 0x419   :  { %18 = sbr.rel (!%p16_p7) target bundleno = 2 (0x2), region = 87 }
 0x420   :  { %649 = vsyncpa [#allocation3], 1 }
 0x421   :  { %651 = vsyncpa [#allocation3 + $0x1], 1 }
 0x422   :  { %652 = vsyncpa [#allocation5], 1 }

</bundles_post_ra>
